<compile_context>
chip_gen: v7x
topology: tpu7x:2x2x1
jax: 0.10.0
libtpu: 0.0.40
codegen_flags: <defaults>
</compile_context>

<pallas_src>
import functools

import numpy as np
import jax
import jax.numpy as jnp
from jax.experimental import pallas as pl
from jax.experimental.pallas import tpu as pltpu

_LANE = 128
_SUBLANE = 8


def _round_up(x, m):
    return ((x + m - 1) // m) * m


def _vmem_capacity_bytes():
    # Generation-aware budget (v5e/v6e: 128 MiB, v7x: 64 MiB per TensorCore).
    try:
        return int(pltpu.get_tpu_info().vmem_capacity_bytes)
    except Exception:
        return 64 << 20  # conservative fallback = smallest current generation


# --------------------------- fused single-pass kernel ---------------------------

def _se_fused_kernel(x_ref, w1_ref, b1_ref, w2_ref, b2_ref, o_ref, *,
                     inv_s, use_mxu, add_residual):
    # x_ref / o_ref: (Bt, C, S) batch tile; weights are full and VMEM-resident.

    # ---- squeeze: lane-reduce sum, scaled by precomputed 1/S (true spatial size) ----
    y = jnp.sum(x_ref[...].astype(jnp.float32), axis=-1) * inv_s            # (Bt, C)

    # ---- excitation MLP in f32 (v5e has no bf16 VPU/EUP) ----
    b1 = b1_ref[...].astype(jnp.float32)
    b2 = b2_ref[...].astype(jnp.float32)
    if use_mxu:
        h = jnp.dot(y, w1_ref[...].astype(jnp.float32),
                    preferred_element_type=jnp.float32) + b1
        h = jnp.maximum(h, 0.0)
        g = jnp.dot(h, w2_ref[...].astype(jnp.float32),
                    preferred_element_type=jnp.float32) + b2
    else:
        # Tiny Bt*C: broadcast-mul + sublane reduce beats a heavily padded MXU op.
        h = jnp.sum(y[:, :, None] * w1_ref[...][None, :, :].astype(jnp.float32),
                    axis=1) + b1
        h = jnp.maximum(h, 0.0)
        g = jnp.sum(h[:, :, None] * w2_ref[...][None, :, :].astype(jnp.float32),
                    axis=1) + b2
    g = jax.nn.sigmoid(g)                                                   # (Bt, C)
    if add_residual:
        g = g + 1.0  # x*sigmoid(g) + x == x*(sigmoid(g)+1)

    # ---- scale: re-read x from VMEM (not kept live in vregs across the MLP);
    #      multiply in f32 and cast the product once on store ----
    o_ref[...] = (x_ref[...].astype(jnp.float32) * g[:, :, None]).astype(o_ref.dtype)


# ------------------ spatial-split fallback (two-pass) kernels -------------------

def _pool_sum_kernel(x_ref, sum_ref, *, s_true, ts):
    # grid (B, n_s); sum_ref block (1, 1, C) is resident across the spatial axis.
    si = pl.program_id(1)

    @pl.when(si == 0)
    def _init():
        sum_ref[...] = jnp.zeros_like(sum_ref)

    x = x_ref[...].astype(jnp.float32)                      # (1, C, ts)
    if s_true % ts != 0:
        # The final partial tile's out-of-range lanes hold stale VMEM: mask them.
        lane = jax.lax.broadcasted_iota(jnp.int32, x.shape, 2) + si * ts
        x = jnp.where(lane < s_true, x, 0.0)
    sum_ref[...] += jnp.sum(x, axis=-1)[:, None, :]         # (1, 1, C)


def _scale_kernel(gate_ref, x_ref, o_ref):
    # gate_ref: (1, C, 1) f32, x_ref/o_ref: (1, C, ts)
    o_ref[...] = (x_ref[...].astype(jnp.float32) * gate_ref[...]).astype(o_ref.dtype)


# --------------------------------- wrapper --------------------------------------

def channel_se_layer(x, w1, b1, w2, b2, *, add_residual=False, max_block_bytes=None):
    """ChannelSELayer forward.

    x : (B, C, *spatial)
    w1: (C, Cr)  b1: (1, Cr)   -- fc1 (nn.Linear weight stored transposed: y @ W^T)
    w2: (Cr, C)  b2: (1, C)    -- fc2 (stored transposed)
    max_block_bytes: test-only override of the per-step block byte budget.
    """
    B, C = x.shape[:2]
    spatial = x.shape[2:]
    S = int(np.prod(spatial)) if spatial else 1
    Cr = w1.shape[1]

    x3 = x.reshape(B, C, S)
    itemsize = jnp.dtype(x3.dtype).itemsize

    # Layout-padded VMEM bytes for one sample's (C, S) slab.
    c_pad = _round_up(max(C, 1), _SUBLANE)
    s_pad = _round_up(max(S, 1), _LANE)
    per_sample = c_pad * s_pad * itemsize

    weight_bytes = sum(int(np.prod(a.shape)) * jnp.dtype(a.dtype).itemsize
                       for a in (w1, b1, w2, b2))
    resident = 2 * weight_bytes  # Pallas double-buffers every input by default.

    budget = int(_vmem_capacity_bytes() * 0.75)
    headroom = 4 << 20

    # Bytes available for the double-buffered in + out batch tiles (4x per block).
    avail = budget - resident - headroom
    if max_block_bytes is not None:
        avail = min(avail, int(max_block_bytes))

    if avail >= 4 * per_sample:
        # ------------------ fused single-pass path: (Bt, C, S) tiles ------------------
        bt = max(1, min(B, avail // (4 * per_sample)))
        # Keep >= min(B, 4) grid steps: gives the pipeline something to prefetch and
        # keeps both v7x TensorCores busy on the "parallel" batch axis.
        bt = max(1, min(bt, pl.cdiv(B, min(B, 4))))
        grid = (pl.cdiv(B, bt),)
        vmem_limit = int(min(max(4 * bt * per_sample + resident + headroom, 8 << 20),
                             budget))

        kernel = functools.partial(
            _se_fused_kernel,
            inv_s=1.0 / float(S),
            use_mxu=(bt * C >= 64),
            add_residual=add_residual,
        )
        out = pl.pallas_call(
            kernel,
            out_shape=jax.ShapeDtypeStruct((B, C, S), x3.dtype),
            grid_spec=pltpu.PrefetchScalarGridSpec(
                num_scalar_prefetch=0,
                grid=grid,
                in_specs=[
                    pl.BlockSpec((bt, C, S), lambda i: (i, 0, 0)),   # x batch tile
                    pl.BlockSpec((C, Cr), lambda i: (0, 0)),         # w1 resident
                    pl.BlockSpec((1, Cr), lambda i: (0, 0)),         # b1 resident
                    pl.BlockSpec((Cr, C), lambda i: (0, 0)),         # w2 resident
                    pl.BlockSpec((1, C), lambda i: (0, 0)),          # b2 resident
                ],
                out_specs=pl.BlockSpec((bt, C, S), lambda i: (i, 0, 0)),
            ),
            compiler_params=pltpu.CompilerParams(
                dimension_semantics=("parallel",),
                vmem_limit_bytes=vmem_limit,
            ),
        )(x3, w1, b1, w2, b2)
        return out.reshape(x.shape)

    # ---------------- spatial-split fallback (per-sample block too large) ----------------
    # Pass 1: pooled spatial sums accumulated across spatial tiles.
    avail_split = budget - headroom
    if max_block_bytes is not None:
        avail_split = min(avail_split, int(max_block_bytes))
    per_lane = c_pad * itemsize
    ts = max(_LANE, (avail_split // (4 * per_lane)) // _LANE * _LANE)
    if ts >= S:
        ts = S  # full-dim block trivially satisfies the (8,128) rule
    n_s = pl.cdiv(S, ts)
    tile_bytes = 4 * c_pad * _round_up(ts, _LANE) * itemsize
    vmem_limit = int(min(max(tile_bytes + headroom, 8 << 20), budget))

    pooled = pl.pallas_call(
        functools.partial(_pool_sum_kernel, s_true=S, ts=ts),
        out_shape=jax.ShapeDtypeStruct((B, 1, C), jnp.float32),
        grid_spec=pltpu.PrefetchScalarGridSpec(
            num_scalar_prefetch=0,
            grid=(B, n_s),
            in_specs=[pl.BlockSpec((1, C, ts), lambda b, s: (b, 0, s))],
            out_specs=pl.BlockSpec((1, 1, C), lambda b, s: (b, 0, 0)),
        ),
        compiler_params=pltpu.CompilerParams(
            dimension_semantics=("parallel", "arbitrary"),
            vmem_limit_bytes=vmem_limit,
        ),
    )(x3)

    # Tiny excitation MLP on (B, C) in plain JAX (negligible next to the HBM passes).
    y = pooled.reshape(B, C) * (1.0 / float(S))
    h = jnp.maximum(y @ w1.astype(jnp.float32) + b1.astype(jnp.float32), 0.0)
    g = jax.nn.sigmoid(h @ w2.astype(jnp.float32) + b2.astype(jnp.float32))
    if add_residual:
        g = g + 1.0
    gate = g.reshape(B, C, 1).astype(jnp.float32)

    # Pass 2: re-stream x and apply the gate.
    out = pl.pallas_call(
        _scale_kernel,
        out_shape=jax.ShapeDtypeStruct((B, C, S), x3.dtype),
        grid_spec=pltpu.PrefetchScalarGridSpec(
            num_scalar_prefetch=0,
            grid=(B, n_s),
            in_specs=[
                pl.BlockSpec((1, C, 1), lambda b, s: (b, 0, 0)),   # gate, per-sample resident
                pl.BlockSpec((1, C, ts), lambda b, s: (b, 0, s)),  # x spatial tile
            ],
            out_specs=pl.BlockSpec((1, C, ts), lambda b, s: (b, 0, s)),
        ),
        compiler_params=pltpu.CompilerParams(
            dimension_semantics=("parallel", "parallel"),
            vmem_limit_bytes=vmem_limit,
        ),
    )(gate, x3)
    return out.reshape(x.shape)


# --------------------------------- reference -------------------------------------

def _reference(x, w1, b1, w2, b2, add_residual=False):
    x = x.astype(jnp.float32)
    B, C = x.shape[:2]
    y = jnp.mean(x.reshape(B, C, -1), axis=-1)
    h = jnp.maximum(y @ w1.astype(jnp.float32) + b1.astype(jnp.float32), 0.0)
    s = jax.nn.sigmoid(h @ w2.astype(jnp.float32) + b2.astype(jnp.float32))
    out = x * s.reshape((B, C) + (1,) * (x.ndim - 2))
    if add_residual:
        out = out + x
    return out


def _make_inputs(key, B, C, H, W, r):
    Cr = C // r
    kx, k1, k2, k3, k4 = jax.random.split(key, 5)
    x = jax.random.normal(kx, (B, C, H, W), dtype=jnp.float32)
    # nn.Linear(C, Cr): weight (Cr, C), bias (Cr,) -> stored transposed for y @ W^T.
    bound1 = 1.0 / np.sqrt(C)
    w1 = jax.random.uniform(k1, (C, Cr), jnp.float32, -bound1, bound1)
    b1 = jax.random.uniform(k2, (1, Cr), jnp.float32, -bound1, bound1)
    # nn.Linear(Cr, C): weight (C, Cr), bias (C,) -> stored transposed (Cr, C).
    bound2 = 1.0 / np.sqrt(Cr)
    w2 = jax.random.uniform(k3, (Cr, C), jnp.float32, -bound2, bound2)
    b2 = jax.random.uniform(k4, (1, C), jnp.float32, -bound2, bound2)
    return x, w1, b1, w2, b2


if __name__ == "__main__":
    key = jax.random.PRNGKey(0)
    k_a, k_b, k_c, k_d = jax.random.split(key, 4)

    # Test 1: ChannelSELayer(spatial_dims=2, in_channels=4, r=2) -- tiny-C VPU path,
    # unpadded S = 256, grid of 2 batch tiles.
    x, w1, b1, w2, b2 = _make_inputs(k_a, B=2, C=4, H=16, W=16, r=2)
    out = jax.block_until_ready(channel_se_layer(x, w1, b1, w2, b2))
    ref = _reference(x, w1, b1, w2, b2)
    assert out.shape == x.shape and out.dtype == x.dtype
    np.testing.assert_allclose(np.asarray(out), np.asarray(ref), rtol=1e-5, atol=1e-5)

    # Test 2: C=64 -> MXU excitation path; S = 64 (< 128 lanes) stays unpadded,
    # store is a masked vst (no host pad/slice HBM passes).
    x, w1, b1, w2, b2 = _make_inputs(k_b, B=2, C=64, H=8, W=8, r=2)
    out = jax.block_until_ready(channel_se_layer(x, w1, b1, w2, b2))
    ref = _reference(x, w1, b1, w2, b2)
    assert out.shape == x.shape and out.dtype == x.dtype
    np.testing.assert_allclose(np.asarray(out), np.asarray(ref), rtol=1e-5, atol=1e-5)

    # Test 3: bf16 activations + weights, B=8 -> packed batch tiles (Bt=2, grid 4),
    # odd S=49 (masked stores); internal math stays f32.
    x, w1, b1, w2, b2 = _make_inputs(k_c, B=8, C=32, H=7, W=7, r=4)
    xb, w1b, b1b, w2b, b2b = (a.astype(jnp.bfloat16) for a in (x, w1, b1, w2, b2))
    out = jax.block_until_ready(channel_se_layer(xb, w1b, b1b, w2b, b2b))
    ref = _reference(xb, w1b, b1b, w2b, b2b)
    assert out.shape == x.shape and out.dtype == jnp.bfloat16
    np.testing.assert_allclose(np.asarray(out, dtype=np.float32), np.asarray(ref),
                               rtol=2e-2, atol=2e-2)

    # Test 4: force the spatial-split (two-pass) fallback with a tiny block budget;
    # S = 900 exercises the partial-tile masking; also covers add_residual=True.
    x, w1, b1, w2, b2 = _make_inputs(k_d, B=2, C=8, H=30, W=30, r=2)
    out = jax.block_until_ready(
        channel_se_layer(x, w1, b1, w2, b2, add_residual=True, max_block_bytes=64 << 10))
    ref = _reference(x, w1, b1, w2, b2, add_residual=True)
    assert out.shape == x.shape and out.dtype == x.dtype
    np.testing.assert_allclose(np.asarray(out), np.asarray(ref), rtol=1e-5, atol=1e-5)

    print("KERNEL_OK")
</pallas_src>

<mosaic_0001>
module attributes {stable_mosaic.version = 11 : i64} {
  func.func @_se_fused_kernel(%arg0: i32, %arg1: memref<1x4x256xf32, #tpu.memory_space<vmem>>, %arg2: memref<4x2xf32, #tpu.memory_space<vmem>>, %arg3: memref<1x2xf32, #tpu.memory_space<vmem>>, %arg4: memref<2x4xf32, #tpu.memory_space<vmem>>, %arg5: memref<1x4xf32, #tpu.memory_space<vmem>>, %arg6: memref<1x4x256xf32, #tpu.memory_space<vmem>>) attributes {dimension_semantics = [#tpu.dimension_semantics<parallel>], iteration_bounds = array<i64: 2>, scalar_prefetch = 0 : i64, scratch_operands = 0 : i64, tpu.core_type = #tpu.core_type<tc>, window_params = [{transform_indices = @transform_0, window_bounds = array<i64: 1, 4, 256>}, {pipeline_mode = #tpu.pipeline_mode<synchronous>, transform_indices = @transform_1, window_bounds = array<i64: 4, 2>}, {pipeline_mode = #tpu.pipeline_mode<synchronous>, transform_indices = @transform_2, window_bounds = array<i64: 1, 2>}, {pipeline_mode = #tpu.pipeline_mode<synchronous>, transform_indices = @transform_3, window_bounds = array<i64: 2, 4>}, {pipeline_mode = #tpu.pipeline_mode<synchronous>, transform_indices = @transform_4, window_bounds = array<i64: 1, 4>}, {transform_indices = @transform_5, window_bounds = array<i64: 1, 4, 256>}]} {
    %c0 = arith.constant 0 : index
    %c0_0 = arith.constant 0 : index
    %c0_1 = arith.constant 0 : index
    %0 = vector.load %arg1[%c0, %c0_0, %c0_1] : memref<1x4x256xf32, #tpu.memory_space<vmem>>, vector<1x4x256xf32>
    %cst = arith.constant dense<0.000000e+00> : vector<1x4xf32>
    %1 = vector.multi_reduction <add>, %0, %cst [2] : vector<1x4x256xf32> to vector<1x4xf32>
    %cst_2 = arith.constant 3.906250e-03 : f32
    %2 = vector.broadcast %cst_2 : f32 to vector<1x4xf32>
    %3 = arith.mulf %1, %2 : vector<1x4xf32>
    %c0_3 = arith.constant 0 : index
    %c0_4 = arith.constant 0 : index
    %4 = vector.load %arg3[%c0_3, %c0_4] : memref<1x2xf32, #tpu.memory_space<vmem>>, vector<1x2xf32>
    %c0_5 = arith.constant 0 : index
    %c0_6 = arith.constant 0 : index
    %5 = vector.load %arg5[%c0_5, %c0_6] : memref<1x4xf32, #tpu.memory_space<vmem>>, vector<1x4xf32>
    %6 = vector.shape_cast %3 : vector<1x4xf32> to vector<1x4x1xf32>
    %c0_7 = arith.constant 0 : index
    %c0_8 = arith.constant 0 : index
    %7 = vector.load %arg2[%c0_7, %c0_8] : memref<4x2xf32, #tpu.memory_space<vmem>>, vector<4x2xf32>
    %8 = vector.shape_cast %7 : vector<4x2xf32> to vector<1x4x2xf32>
    %9 = vector.broadcast %6 : vector<1x4x1xf32> to vector<1x4x2xf32>
    %10 = arith.mulf %9, %8 : vector<1x4x2xf32>
    %cst_9 = arith.constant dense<0.000000e+00> : vector<1x2xf32>
    %11 = vector.multi_reduction <add>, %10, %cst_9 [1] : vector<1x4x2xf32> to vector<1x2xf32>
    %12 = arith.addf %11, %4 : vector<1x2xf32>
    %cst_10 = arith.constant 0.000000e+00 : f32
    %13 = vector.broadcast %cst_10 : f32 to vector<1x2xf32>
    %14 = arith.maximumf %12, %13 : vector<1x2xf32>
    %15 = vector.shape_cast %14 : vector<1x2xf32> to vector<1x2x1xf32>
    %c0_11 = arith.constant 0 : index
    %c0_12 = arith.constant 0 : index
    %16 = vector.load %arg4[%c0_11, %c0_12] : memref<2x4xf32, #tpu.memory_space<vmem>>, vector<2x4xf32>
    %17 = vector.shape_cast %16 : vector<2x4xf32> to vector<1x2x4xf32>
    %18 = vector.broadcast %15 : vector<1x2x1xf32> to vector<1x2x4xf32>
    %19 = arith.mulf %18, %17 : vector<1x2x4xf32>
    %cst_13 = arith.constant dense<0.000000e+00> : vector<1x4xf32>
    %20 = vector.multi_reduction <add>, %19, %cst_13 [1] : vector<1x2x4xf32> to vector<1x4xf32>
    %21 = arith.addf %20, %5 : vector<1x4xf32>
    %22 = arith.negf %21 : vector<1x4xf32>
    %23 = math.exp %22 : vector<1x4xf32>
    %cst_14 = arith.constant 1.000000e+00 : f32
    %24 = vector.broadcast %cst_14 : f32 to vector<1x4xf32>
    %25 = arith.addf %24, %23 : vector<1x4xf32>
    %26 = arith.divf %24, %25 : vector<1x4xf32>
    %c0_15 = arith.constant 0 : index
    %c0_16 = arith.constant 0 : index
    %c0_17 = arith.constant 0 : index
    %27 = vector.load %arg1[%c0_15, %c0_16, %c0_17] : memref<1x4x256xf32, #tpu.memory_space<vmem>>, vector<1x4x256xf32>
    %28 = vector.shape_cast %26 : vector<1x4xf32> to vector<1x4x1xf32>
    %29 = vector.broadcast %28 : vector<1x4x1xf32> to vector<1x4x256xf32>
    %30 = arith.mulf %27, %29 : vector<1x4x256xf32>
    %c0_18 = arith.constant 0 : index
    %c0_19 = arith.constant 0 : index
    %c0_20 = arith.constant 0 : index
    %31 = vector.load %arg6[%c0_18, %c0_19, %c0_20] : memref<1x4x256xf32, #tpu.memory_space<vmem>>, vector<1x4x256xf32>
    tpu.vector_store %arg6[%c0_18, %c0_19, %c0_20], %30 {strides = array<i32>} : memref<1x4x256xf32, #tpu.memory_space<vmem>>, vector<1x4x256xf32>,
    return
  }
  func.func @transform_0(%arg0: i32) -> (i32, i32, i32) {
    %c0_i32 = arith.constant 0 : i32
    %c0_i32_0 = arith.constant 0 : i32
    %c0_i32_1 = arith.constant 0 : i32
    return %arg0, %c0_i32, %c0_i32_0 : i32, i32, i32
  }
  func.func @transform_1(%arg0: i32) -> (i32, i32) {
    %c0_i32 = arith.constant 0 : i32
    %c0_i32_0 = arith.constant 0 : i32
    %c0_i32_1 = arith.constant 0 : i32
    return %c0_i32, %c0_i32_0 : i32, i32
  }
  func.func @transform_2(%arg0: i32) -> (i32, i32) {
    %c0_i32 = arith.constant 0 : i32
    %c0_i32_0 = arith.constant 0 : i32
    %c0_i32_1 = arith.constant 0 : i32
    return %c0_i32, %c0_i32_0 : i32, i32
  }
  func.func @transform_3(%arg0: i32) -> (i32, i32) {
    %c0_i32 = arith.constant 0 : i32
    %c0_i32_0 = arith.constant 0 : i32
    %c0_i32_1 = arith.constant 0 : i32
    return %c0_i32, %c0_i32_0 : i32, i32
  }
  func.func @transform_4(%arg0: i32) -> (i32, i32) {
    %c0_i32 = arith.constant 0 : i32
    %c0_i32_0 = arith.constant 0 : i32
    %c0_i32_1 = arith.constant 0 : i32
    return %c0_i32, %c0_i32_0 : i32, i32
  }
  func.func @transform_5(%arg0: i32) -> (i32, i32, i32) {
    %c0_i32 = arith.constant 0 : i32
    %c0_i32_0 = arith.constant 0 : i32
    %c0_i32_1 = arith.constant 0 : i32
    return %arg0, %c0_i32, %c0_i32_0 : i32, i32, i32
  }
}

</mosaic_0001>

<bundles_post_ra>
// kernel: tpu_custom_call.1
= control target key start
LH: loop header
LB: loop body
LE: loop exit
PB: predicated region body
PF: predicated region fallthrough
CT: control target
= control target key end

     0   :  { %10 = vsyncpa [#allocation3], 0  ;;  %s770_s0 = inlined_call_operand.hbm [shape: f32[2,4,256], index: 0, kind: input, shape index: {}]   ;;  %s771_s1 = inlined_call_operand.vmem [shape: f32[4,2], index: 1, kind: input, shape index: {}]   ;;  %s772_s2 = inlined_call_operand.vmem [shape: f32[1,2], index: 2, kind: input, shape index: {}]   ;;  %s773_s3 = inlined_call_operand.vmem [shape: f32[2,4], index: 3, kind: input, shape index: {}]   ;;  %s774_s4 = inlined_call_operand.vmem [shape: f32[1,4], index: 4, kind: input, shape index: {}]   ;;  %s775_s5 = inlined_call_operand.hbm [shape: f32[2,4,256], index: 5, kind: output, shape index: {}]  }
   0x1   :  { %12 = vsyncpa [#allocation3 + $0x1], 0 }
   0x2   :  { %13 = vsyncpa [#allocation4], 0 }
   0x3   :  { %15 = vsyncpa [#allocation4 + $0x1], 0  ;;  %s593_s18 = smov 0   ;;  %s595_s19 = smov 0  }
   0x4   :  { %s597_s20 = smov 0   ;;  %s599_s21 = smov 0  }
   0x5 LB: > { %s614_s22 = sadd.s32 4294967295, %s558_s21   ;;  %s393_s23 = sadd.s32 4294967294, %s558_s21   ;;  %s558_s21 = sphi %s599_s21, %s790_s21   ;;  %s554_s20 = sphi %s597_s20, %s789_s20   ;;  %s550_s19 = sphi %s595_s19, %s788_s19   ;;  %s546_s18 = sphi %s593_s18, %s787_s18  }
   0x6   : > { %s618_s24 = sadd.s32 1, %s558_s21   ;;  %s28_s25 = sadd.s32 1, %s554_s20 }
   0x7   : > { %s25_s26 = ssub.s32 %s558_s21, %s618_s24  ;;  %p35_p0 = scmp.ne.s32.totalorder %s554_s20, %s550_s19 }
   0x8   : > { %p26_p1 = scmp.eq.s32.totalorder %s25_s26, 0  ;;  %p36_p2 = scmp.eq.s32.totalorder %s558_s21, 0 }
   0x9   : > { %p41_p3 = scmp.ne.s32.totalorder %s550_s19, %s546_s18  ;;  %p42_p4 = scmp.eq.s32.totalorder %s614_s22, 0 }
   0xa   : > { %s630_s27 = scalar_select %p26_p1, %s554_s20, %s28_s25  }
   0xb   : > { %p632_p5 = por %p36_p2, %p35_p0  ;;  %p636_p6 = por %p42_p4, %p41_p3 }
   0xc   : > { %p149_p7 = scmp.eq.s32.totalorder %s614_s22, 1  ;;  %p155_p8 = scmp.eq.s32.totalorder %s393_s23, 1 }
   0xd   : > { %p422_p10 = scmp.lt.s32.totalorder %s558_s21, 2  ;;  %s187_s7 = sand.u32 1, %s554_s20  }
   0xe   : > { %p643_p11 = por %p149_p7, %p35_p0  ;;  %p647_p12 = por %p155_p8, %p41_p3 }
   0xf   : > { %s408_s8 = sshll.u32 %s558_s21, 7  ;;  %s396_s9 = sshll.u32 %s187_s7, 3 }
  0x10   : > { %s779_s30 = scalar_select %p643_p11, 1, 0 }
  0x11   : > { %s780_s6 = scalar_select %p647_p12, 1, 0 }
  0x12   : > { %s656_s12 = scalar_lea.hbm %s770_s0, %s408_s8  ;;  %s191_s13 = scalar_lea.vmem [#allocation2], %s396_s9 }
  0x13   : > { %s199_s14 = sshll.u32 %s191_s13, 4  ;;  %p660_p13 = pnand %p422_p10, %p632_p5  ;;  %s664_s14 = int_to_ptr.vmem [resolvable:$true] %s199_s14 }
  0x14   : > { %s188_s16 = scalar_lea.sflag [#allocation3], %s187_s7  ;;  %s462_s17 = scalar_lea.hbm %s656_s12, 128 }
  0x15   : > { %p463_p2 = scmp.ne.s32.totalorder %s656_s12, %s462_s17  ;;  %p464_p3 = pneg %p660_p13 }
  0x16   : > { %s467_s26 = scalar_lea.hbm %s770_s0, 256  ;;  %p468_p5 = scmp.lt.u32.totalorder %s656_s12, %s770_s0 }
  0x17   : > { %p465_p4 = pnand %p464_p3, %p463_p2  ;;  %p469_p8 = scmp.lt.u32.totalorder %s467_s26, %s462_s17 }
  0x18   : > { %p471_p9 = scmp.lt.u32.totalorder %s462_s17, %s656_s12 }
  0x19   : > { %p466_p7 = pneg %p465_p4  ;;  %p470_p10 = por %p469_p8, %p468_p5 }
  0x1b   : > { %p472_p0 = por %p471_p9, %p470_p10 }
  0x1d   : > { %p473_p1 = pnand %p472_p0, %p466_p7 }
  0x1f   : > { %476 = shalt.err (!%p473_p1)
}
  0x20   : > { %s477_s7 = scalar_lea.vmem %s664_s14, 128  ;;  %s560_s9 = smov [#allocation2]  }
  0x21   : > { %p478_p2 = scmp.ne.s32.totalorder %s664_s14, %s477_s7  ;;  %s482_s10 = sshll.u32 %s560_s9, 4  ;;  %s483_s10 = int_to_ptr.vmem [resolvable:$false] %s482_s10 }
  0x22   : > { %s484_s11 = scalar_lea.vmem %s483_s10, 256  ;;  %p485_p11 = scmp.lt.s32.totalorder %s664_s14, %s483_s10 }
  0x23   : > { %p480_p4 = pnand %p478_p2, %p464_p3  ;;  %p486_p5 = scmp.lt.s32.totalorder %s484_s11, %s477_s7 }
  0x25   : > { %p481_p12 = pneg %p480_p4  ;;  %p487_p8 = por %p486_p5, %p485_p11 }
  0x27   : > { %p488_p9 = pnand %p487_p8, %p481_p12 }
  0x29   : > { %491 = shalt.err (!%p488_p9)
}
  0x2a   : > { %417 = dma.hbm_to_vmem [thread:$0]  (!%p660_p13), %s656_s12, 128, %s664_s14, %s188_s16  }
  0x2b   : > { %p782_p0 = scmp.lt.s32.totalorder %s558_s21, 3  ;;  %p783_p1 = scmp.ge.s32.totalorder %s558_s21, 1 }
  0x2d   : > { %p205_p3 = pnand %p783_p1, %p782_p0 }
  0x2e   : > { %s698_s13 = sand.u32 (!%p205_p3), 1, %s550_s19  }
  0x2f   : > { %208 = sbr.rel (%p205_p3) target bundleno = 519 (0x207), region = 40  ;;  %s400_s17 = sshll.u32 (!%p205_p3), %s698_s13, 3 }
  0x30   : > { %s211_s23 = scalar_lea.sflag (!%p205_p3), [#allocation3], %s698_s13  ;;  %s214_s15 = scalar_lea.vmem (!%p205_p3), [#allocation2], %s400_s17 }
  0x36   : > { %537 = dma.done.wait (%p636_p6), %s211_s23, 128  }
  0x37   : > { %539 = vsyncadd (%p636_p6), %s211_s23, 4294967168  ;;  %vm245_vm0 = vcmask 1043456   ;;  %v241_v0 = vld [vmem:[%s214_s15] sm:$0xff]  ;;  %vm256_vm1 = vcmask 11264   ;;  %v266_v13 = vlaneseq  ;;  %vm275_vm2 = vcmask 25600   ;;  %s409_s7 = sshll.u32 %s614_s22, 7 }
  0x38   : > { %v243_v1 = vcombine.high %v241_v0, %v241_v0  ;;  %v246_v2 = vsel %vm245_vm0, %v241_v0, 0.0  ;;  %v254_v5 = vld [vmem:[%s771_s1] sm:$0xf]  ;;  %v561_v40 = vmov 839922192   ;;  %s240_s9 = scalar_lea.vmem [#allocation5], %s400_s17  ;;  %s726_s15 = scalar_lea.hbm %s775_s5, %s409_s7 }
  0x39   : > { %v267_v16 = vshrl.u32 %v266_v13, 7  ;;  %v252_v17 = vld [vmem:[%s772_s2] sm:$0x1]  ;;  %v299_v41 = vunpack.c.l.s4 %v561_v40  ;;  %s323_s10 = sshll.u32 %s240_s9, 4  ;;  %s309_s12 = scalar_lea.sflag [#allocation4], %s698_s13  ;;  %s728_s10 = int_to_ptr.vmem [resolvable:$true] %s323_s10 }
  0x3a   : > { %v247_v3 = vsel %vm245_vm0, %v243_v1, 0.0  ;;  %v273_v23 = vld [vmem:[%s773_s3] sm:$0x3]  ;;  %s492_s14 = scalar_lea.vmem %s728_s10, 128  ;;  %p784_p11 = scmp.ne.s32.totalorder %s779_s30, 0 }
  0x3b   : > { %v248_v4 = vadd.f32 %v247_v3, %v246_v2  ;;  %v268_v20 = vsub.s32 0, %v267_v16  ;;  %v253_v32 = vld [vmem:[%s774_s4] sm:$0x1]  ;;  %v300_v42 = vunpack.c.0.s8 %v299_v41  ;;  %p493_p6 = scmp.ne.s32.totalorder %s728_s10, %s492_s14  ;;  %s562_s22 = smov [#allocation5]  }
  0x3c   : > { %s496_s17 = sshll.u32 %s562_s22, 4  ;;  %s497_s17 = int_to_ptr.vmem [resolvable:$false] %s496_s17 }
  0x3d   : > { %249 = vadd.xlane.f32.xlu0 %v248_v4  ;;  %v303_v43 = vsub.s32 %v300_v42, %v267_v16  ;;  %p494_p12 = pnand %p493_p6, %p784_p11  ;;  %s498_s29 = scalar_lea.vmem %s497_s17, 256 }
  0x3e   : > { %p499_p7 = scmp.lt.s32.totalorder %s728_s10, %s497_s17  ;;  %p500_p10 = scmp.lt.s32.totalorder %s498_s29, %s492_s14 }
  0x3f   : > { %p495_p13 = pneg %p494_p12 }
  0x40   : > { %p501_p2 = por %p500_p10, %p499_p7 }
  0x42   : > { %p502_p4 = pnand %p501_p2, %p495_p13 }
  0xca   : > { %v250_v6 = vpop.xlane.xlu0 %249 }
  0xcb   : > { %v251_v7 = vmul.f32 0.00390625, %v250_v6 }
  0xcd   : > { %v255_v8 = vmul.f32 %v254_v5, %v251_v7 }
  0xcf   : > { %v257_v9 = vsel %vm256_vm1, %v255_v8, 0.0 }
  0xd0   : > { %v258_v10 = vrot.slane %v257_v9, 4 }
  0xd2   : > { %v259_v11 = vadd.f32 %v258_v10, %v257_v9 }
  0xd4   : > { %v260_v12 = vrot.slane %v259_v11, 2 }
  0xd6   : > { %v261_v14 = vadd.f32 %v260_v12, %v259_v11 }
  0xd8   : > { %v262_v15 = vrot.slane %v261_v14, 1 }
  0xda   : > { %v263_v18 = vadd.f32 %v262_v15, %v261_v14 }
  0xdc   : > { %v264_v19 = vadd.f32 %v263_v18, %v252_v17 }
  0xde   : > { %v265_v21 = vmax.f32 %v264_v19, 0.0 }
  0xe0   : > { %v269_v22 = vrot.slane %v265_v21, %v268_v20 }
  0xe2   : > { %271 = vbcast.lane.b32.xlu0 %v269_v22, 256 }
 0x154   : > { %v272_v24 = vpop.permute.xlu0 %271 }
 0x155   : > { %v274_v25 = vmul.f32 %v273_v23, %v272_v24 }
 0x157   : > { %v276_v26 = vsel %vm275_vm2, %v274_v25, 0.0 }
 0x158   : > { %v277_v27 = vrot.slane %v276_v26, 4 }
 0x15a   : > { %v278_v28 = vadd.f32 %v277_v27, %v276_v26 }
 0x15c   : > { %v279_v29 = vrot.slane %v278_v28, 2 }
 0x15e   : > { %v280_v30 = vadd.f32 %v279_v29, %v278_v28 }
 0x160   : > { %v281_v31 = vrot.slane %v280_v30, 1 }
 0x162   : > { %v282_v33 = vadd.f32 %v281_v31, %v280_v30 }
 0x164   : > { %v283_v34 = vadd.f32 %v282_v33, %v253_v32 }
 0x166   : > { %v402_v35 = vmul.f32 -1.442695, %v283_v34 }
 0x168   : > { %458 = vpow2.f32 %v402_v35 }
 0x172   : > { %v459_v36 = vpop.eup %458 }
 0x173   : > { %v287_v37 = vadd.f32 1.0, %v459_v36 }
 0x175   : > { %460 = vrcp.f32 %v287_v37 }
 0x17f   : > { %v461_v38 = vpop.eup %460 }
 0x180   : > { %v293_v39 = vrot.slane %v461_v38, %v268_v20 }
 0x182   : > { %295 = vbcast.lane.b32.xlu1 %v293_v39, 256 }
 0x1f4   : > { %v296_v44 = vpop.permute.xlu1 %295 }
 0x1f5   : > { %v304_v45 = vrot.slane %v296_v44, %v303_v43 }
 0x1f7   : > { %v306_v46 = vmul.f32 %v304_v45, %v241_v0 }
 0x1f9   : > { %307 = vst [vmem:[%s240_s9] sm:$0xff] %v306_v46 }
 0x1fa   : > { %505 = shalt.err (!%p502_p4)
}
 0x1fb   : > { %s506_s13 = scalar_lea.hbm %s726_s15, 128  ;;  %s510_s26 = scalar_lea.hbm %s775_s5, 256 }
 0x1fc   : > { %p507_p5 = scmp.ne.s32.totalorder %s726_s15, %s506_s13  ;;  %p511_p0 = scmp.lt.u32.totalorder %s726_s15, %s775_s5 }
 0x1fd   : > { %p512_p1 = scmp.lt.u32.totalorder %s510_s26, %s506_s13  ;;  %p514_p6 = scmp.lt.u32.totalorder %s506_s13, %s726_s15 }
 0x1fe   : > { %p508_p8 = pnand %p507_p5, %p784_p11 }
 0x1ff   : > { %p513_p3 = por %p512_p1, %p511_p0 }
 0x200   : > { %p509_p9 = pneg %p508_p8 }
 0x201   : > { %p515_p12 = por %p514_p6, %p513_p3 }
 0x203   : > { %p516_p13 = pnand %p515_p12, %p509_p9 }
 0x205   : > { %519 = shalt.err (!%p516_p13)
}
 0x206   : > { %412 = dma.vmem_to_hbm [thread:$0]  (%p784_p11), %s728_s10, 128, %s726_s15, %s309_s12  }
 0x207 PF: > { %s335_s7 = sand.u32 1, %s546_s18   ;;  %p785_p7 = scmp.ne.s32.totalorder %s780_s6, 0 }
 0x208   : > { %p786_p10 = scmp.ge.s32.totalorder %s558_s21, 2  ;;  %s336_s9 = scalar_lea.sflag [#allocation4], %s335_s7 }
 0x20a   : > { %p419_p2 = pnand %p786_p10, %p785_p7 }
 0x20c   : > { %541 = dma.done.wait (!%p419_p2), %s336_s9, 128  }
 0x20d   : > { %543 = vsyncadd (!%p419_p2), %s336_s9, 4294967168  ;;  %p18_p4 = scmp.ge.s32.totalorder %s618_s24, 4   ;;  %s787_s18 = smov %s550_s19 }
 0x20e   : > { %s788_s19 = smov %s554_s20  ;;  %s789_s20 = smov %s630_s27 }
 0x20f   : > { %s790_s21 = smov %s618_s24  ;;  %20 = sbr.rel (!%p18_p4) target bundleno = 5 (0x5), region = 85 }
 0x216   :  { %341 = vsyncpa [#allocation3], 1 }
 0x217   :  { %343 = vsyncpa [#allocation3 + $0x1], 1 }
 0x218   :  { %344 = vsyncpa [#allocation4], 1 }
 0x219   :  { %346 = vsyncpa [#allocation4 + $0x1], 1 }

</bundles_post_ra>
